<compile_context>
chip_gen: v6e
topology: v6e:2x2x1
jax: 0.10.0
libtpu: 0.0.40
codegen_flags: <defaults>
</compile_context>

<pallas_src>
import jax
import jax.numpy as jnp
from jax.experimental import pallas as pl
from jax.experimental.pallas import tpu as pltpu


def _round_up(x, m):
    return ((x + m - 1) // m) * m


def _classifier_kernel(x_ref, w1_ref, b1_ref, w2_ref, b2_ref, w3_ref, b3_ref,
                       o_ref, h_ref):
    # ---- Layer 1: (tile_n, hidden) @ (hidden, 512), bf16 MXU, f32 accumulate.
    # Cast the streamed x tile to bf16 on vregs (hides under the MXU work).
    x_bf16 = x_ref[...].astype(jnp.bfloat16)
    h1 = jnp.dot(x_bf16, w1_ref[...], preferred_element_type=jnp.float32)
    h1 = h1 + b1_ref[...]                                   # (1,512) bias broadcast
    # ReLU in f32 (no bf16 VPU on v5e), store bf16 into the shared scratch.
    h_ref[...] = jnp.maximum(h1, 0.0).astype(jnp.bfloat16)

    # ---- Layer 2: (tile_n, 512) @ (512, 512), bf16 MXU, f32 accumulate.
    h2 = jnp.dot(h_ref[...], w2_ref[...], preferred_element_type=jnp.float32)
    h2 = h2 + b2_ref[...]
    h_ref[...] = jnp.maximum(h2, 0.0).astype(jnp.bfloat16)

    # ---- Layer 3: 512 -> 1 as VPU multiply + lane reduction.
    # w3 arrives as f32, so bf16*f32 promotes and the reduce accumulates in f32.
    out = jnp.sum(h_ref[...] * w3_ref[...], axis=-1, keepdims=True) + b3_ref[...]
    o_ref[...] = out.astype(o_ref.dtype)


def _vmem_limit_bytes():
    """Per-generation scoped-VMEM request: 96 MiB on 128-MiB chips (v5e/v6e),
    ~48 MiB on v7x's 64-MiB TCs.  Falls back to the conservative 48 MiB."""
    cap = 64 * 1024 * 1024
    try:
        info = pltpu.get_tpu_info()
        cap = int(getattr(info, "vmem_capacity_bytes", cap))
    except Exception:
        pass
    return max(32 * 1024 * 1024, min(cap - 16 * 1024 * 1024, 96 * 1024 * 1024))


def _choose_tile_n(n, hidden, x_itemsize, vmem_limit, max_tile_n):
    """Largest batch tile that fits the VMEM budget, >= 2 grid steps for large
    batches (v7x dual-TC sharding of the 'parallel' axis), multiple of 16."""
    # VMEM-resident weights / biases (counted x2 buffers to be conservative).
    weight_bytes = 2 * (hidden * 512 * 2 + 512 * 512 * 2 + 2 * 512 * 4 + 512 * 4 + 4)
    budget = vmem_limit - weight_bytes - (4 << 20)          # Mosaic scratch headroom
    # Per batch-row: double-buffered x tile + bf16 scratch + double-buffered out.
    per_row = 2 * hidden * x_itemsize + 512 * 2 + 2 * 4
    fit = max(budget // per_row, 16)
    tile = min(max_tile_n, fit, _round_up(n, 16))
    if n > 256:
        tile = min(tile, pl.cdiv(n, 2))                     # >= 2 grid steps
    return max(16, _round_up(tile, 16))


def classifier_forward(x_nchw, w1, w2, w3_row, b1=None, b2=None, b3=None,
                       *, max_tile_n=2048):
    """Forward pass of `Classifier`.

    x_nchw : (N, hidden, 1, 1) activations (any float dtype; cast to bf16
             on-chip right before the layer-1 matmul).
    w1     : (hidden, 512)  matmul-ready (C_in, C_out) conv1x1 weight.
    w2     : (512, 512)     matmul-ready (C_in, C_out) conv1x1 weight.
    w3_row : (1, 512)       final conv1x1 weight as the squeezed (C_out, C_in) row.
    b1/b2/b3 : optional biases (512,), (512,), (1,); None -> bias-free conv1x1.
    Returns (N, 1) float32, matching `out.view(out.shape[0], 1)`.
    """
    n, c, h, w = x_nchw.shape
    assert h == 1 and w == 1, "Classifier assumes 1x1 spatial (final view(N, 1))"
    assert w3_row.shape[0] == 1, "final .view(N, 1) requires num_classes == 1"
    hidden = c

    # Flatten (free: H=W=1, contiguous) and KEEP the native dtype; no standalone
    # HBM cast pass for x.
    x2d = x_nchw.reshape(n, hidden)

    # Guarantee the bf16-MXU path regardless of caller dtype; weights are small
    # and fetched once per call (constant index_maps -> VMEM-resident).
    w1 = w1.astype(jnp.bfloat16)
    w2 = w2.astype(jnp.bfloat16)
    w3f = w3_row.astype(jnp.float32)                        # f32 row -> f32 VPU reduce
    b1 = (jnp.zeros((512,), jnp.float32) if b1 is None else b1)
    b2 = (jnp.zeros((512,), jnp.float32) if b2 is None else b2)
    b3 = (jnp.zeros((1,), jnp.float32) if b3 is None else b3)
    b1 = b1.astype(jnp.float32).reshape(1, 512)
    b2 = b2.astype(jnp.float32).reshape(1, 512)
    b3 = b3.astype(jnp.float32).reshape(1, 1)

    vmem_limit = _vmem_limit_bytes()
    tile_n = _choose_tile_n(n, hidden, x2d.dtype.itemsize, vmem_limit, max_tile_n)
    grid = (pl.cdiv(n, tile_n),)      # no wrapper-side pad; partial tail block is masked

    flops = 2 * n * (hidden * 512 + 512 * 512 + 512)
    bytes_accessed = (x2d.size * x2d.dtype.itemsize
                      + (w1.size + w2.size) * 2
                      + (w3f.size + b1.size + b2.size + b3.size) * 4
                      + n * 4)

    out = pl.pallas_call(
        _classifier_kernel,
        out_shape=jax.ShapeDtypeStruct((n, 1), jnp.float32),
        grid=grid,
        in_specs=[
            pl.BlockSpec((tile_n, hidden), lambda i: (i, 0)),   # streamed x tiles
            pl.BlockSpec((hidden, 512), lambda i: (0, 0)),      # w1 (resident)
            pl.BlockSpec((1, 512), lambda i: (0, 0)),           # b1
            pl.BlockSpec((512, 512), lambda i: (0, 0)),         # w2
            pl.BlockSpec((1, 512), lambda i: (0, 0)),           # b2
            pl.BlockSpec((1, 512), lambda i: (0, 0)),           # w3 row (f32)
            pl.BlockSpec((1, 1), lambda i: (0, 0)),             # b3
        ],
        out_specs=pl.BlockSpec((tile_n, 1), lambda i: (i, 0)),
        scratch_shapes=[pltpu.VMEM((tile_n, 512), jnp.bfloat16)],   # bf16 h1/h2
        compiler_params=pltpu.CompilerParams(
            dimension_semantics=("parallel",),
            vmem_limit_bytes=vmem_limit,
        ),
        cost_estimate=pl.CostEstimate(flops=flops, transcendentals=0,
                                      bytes_accessed=bytes_accessed),
    )(x2d, w1, b1, w2, b2, w3f, b3)

    return out                                               # (N, 1)


def make_params(hidden_size, num_classes=1, seed=0, dtype=jnp.bfloat16, bias=True):
    """Deterministic synthetic weights in matmul-ready layout.

    PyTorch conv1x1 weights are (C_out, C_in, 1, 1); w1/w2 are stored as the
    transposed (C_in, C_out) matmul form, w3 as the squeezed (C_out, C_in) row.
    bias=True mirrors nn.Conv2d's default.
    """
    keys = jax.random.split(jax.random.PRNGKey(seed), 6)
    w1 = (jax.random.normal(keys[0], (hidden_size, 512), jnp.float32) * 0.05).astype(dtype)
    w2 = (jax.random.normal(keys[1], (512, 512), jnp.float32) * 0.05).astype(dtype)
    w3 = (jax.random.normal(keys[2], (num_classes, 512), jnp.float32) * 0.05).astype(dtype)
    if bias:
        b1 = jax.random.normal(keys[3], (512,), jnp.float32) * 0.05
        b2 = jax.random.normal(keys[4], (512,), jnp.float32) * 0.05
        b3 = jax.random.normal(keys[5], (num_classes,), jnp.float32) * 0.05
    else:
        b1 = b2 = b3 = None
    return w1, w2, w3, b1, b2, b3


def _reference(x_nchw, w1, w2, w3, b1, b2, b3):
    """Pure-JAX reference with the SAME precision choices as the kernel."""
    n, c, _, _ = x_nchw.shape
    x2d = x_nchw.reshape(n, c)
    b1 = jnp.zeros((512,), jnp.float32) if b1 is None else b1
    b2 = jnp.zeros((512,), jnp.float32) if b2 is None else b2
    b3 = jnp.zeros((1,), jnp.float32) if b3 is None else b3
    h1 = jnp.dot(x2d.astype(jnp.bfloat16), w1.astype(jnp.bfloat16),
                 preferred_element_type=jnp.float32) + b1
    h1 = jnp.maximum(h1, 0.0).astype(jnp.bfloat16)
    h2 = jnp.dot(h1, w2.astype(jnp.bfloat16),
                 preferred_element_type=jnp.float32) + b2
    h2 = jnp.maximum(h2, 0.0).astype(jnp.bfloat16)
    return jnp.sum(h2 * w3.astype(jnp.float32), axis=-1, keepdims=True) + b3


if __name__ == "__main__":
    hidden_size = 32
    num_classes = 1
    batch = 2

    key = jax.random.PRNGKey(0)
    k_x1, k_x2 = jax.random.split(key)
    x = jax.random.normal(k_x1, (batch, hidden_size, 1, 1), jnp.float32)  # NCHW

    w1, w2, w3, b1, b2, b3 = make_params(hidden_size, num_classes, seed=0)

    # Small batch: single partial grid step (batch < tile_n), no padding pass.
    out = jax.block_until_ready(classifier_forward(x, w1, w2, w3, b1, b2, b3))
    ref = _reference(x, w1, w2, w3, b1, b2, b3)
    assert out.shape == (batch, 1), out.shape
    assert jnp.allclose(out, ref, atol=2e-3, rtol=2e-3), (out, ref)

    # Non-divisible batch across several grid steps (exercises the masked
    # partial tail block without any wrapper-side jnp.pad).
    x2 = jax.random.normal(k_x2, (37, hidden_size, 1, 1), jnp.float32)
    out2 = jax.block_until_ready(
        classifier_forward(x2, w1, w2, w3, b1, b2, b3, max_tile_n=16))
    ref2 = _reference(x2, w1, w2, w3, b1, b2, b3)
    assert out2.shape == (37, 1), out2.shape
    assert jnp.allclose(out2, ref2, atol=2e-3, rtol=2e-3), (out2, ref2)

    print("KERNEL_OK")
</pallas_src>

<mosaic_0001>
module attributes {stable_mosaic.version = 11 : i64} {
  func.func @_classifier_kernel(%arg0: i32, %arg1: memref<16x32xf32, #tpu.memory_space<vmem>>, %arg2: memref<32x512xbf16, #tpu.memory_space<vmem>>, %arg3: memref<1x512xf32, #tpu.memory_space<vmem>>, %arg4: memref<512x512xbf16, #tpu.memory_space<vmem>>, %arg5: memref<1x512xf32, #tpu.memory_space<vmem>>, %arg6: memref<1x512xf32, #tpu.memory_space<vmem>>, %arg7: memref<1x1xf32, #tpu.memory_space<vmem>>, %arg8: memref<16x1xf32, #tpu.memory_space<vmem>>, %arg9: memref<16x512xbf16, #tpu.memory_space<vmem>>) attributes {dimension_semantics = [#tpu.dimension_semantics<parallel>], iteration_bounds = array<i64: 1>, scalar_prefetch = 0 : i64, scratch_operands = 1 : i64, tpu.core_type = #tpu.core_type<tc>, window_params = [{transform_indices = @transform_0, window_bounds = array<i64: 16, 32>}, {pipeline_mode = #tpu.pipeline_mode<synchronous>, transform_indices = @transform_1, window_bounds = array<i64: 32, 512>}, {pipeline_mode = #tpu.pipeline_mode<synchronous>, transform_indices = @transform_2, window_bounds = array<i64: 1, 512>}, {pipeline_mode = #tpu.pipeline_mode<synchronous>, transform_indices = @transform_3, window_bounds = array<i64: 512, 512>}, {pipeline_mode = #tpu.pipeline_mode<synchronous>, transform_indices = @transform_4, window_bounds = array<i64: 1, 512>}, {pipeline_mode = #tpu.pipeline_mode<synchronous>, transform_indices = @transform_5, window_bounds = array<i64: 1, 512>}, {pipeline_mode = #tpu.pipeline_mode<synchronous>, transform_indices = @transform_6, window_bounds = array<i64: 1, 1>}, {transform_indices = @transform_7, window_bounds = array<i64: 16, 1>}]} {
    %c0 = arith.constant 0 : index
    %c0_0 = arith.constant 0 : index
    %0 = vector.load %arg1[%c0, %c0_0] : memref<16x32xf32, #tpu.memory_space<vmem>>, vector<16x32xf32>
    %1 = arith.truncf %0 : vector<16x32xf32> to vector<16x32xbf16>
    %c0_1 = arith.constant 0 : index
    %c0_2 = arith.constant 0 : index
    %2 = vector.load %arg2[%c0_1, %c0_2] : memref<32x512xbf16, #tpu.memory_space<vmem>>, vector<32x512xbf16>
    %cst = arith.constant dense<0.000000e+00> : vector<16x512xf32>
    %3 = tpu.matmul %1, %2, %cst {dimension_numbers = #tpu.dot_dimension_numbers<[1], [0], [0], [1], [0, 0, 1, 1], [], []>} : vector<16x32xbf16>, vector<32x512xbf16>, vector<16x512xf32> -> vector<16x512xf32>
    %c0_3 = arith.constant 0 : index
    %c0_4 = arith.constant 0 : index
    %4 = vector.load %arg3[%c0_3, %c0_4] : memref<1x512xf32, #tpu.memory_space<vmem>>, vector<1x512xf32>
    %5 = vector.broadcast %4 : vector<1x512xf32> to vector<16x512xf32>
    %6 = arith.addf %3, %5 : vector<16x512xf32>
    %cst_5 = arith.constant 0.000000e+00 : f32
    %7 = vector.broadcast %cst_5 : f32 to vector<16x512xf32>
    %8 = arith.maximumf %6, %7 : vector<16x512xf32>
    %9 = arith.truncf %8 : vector<16x512xf32> to vector<16x512xbf16>
    %c0_6 = arith.constant 0 : index
    %c0_7 = arith.constant 0 : index
    %10 = vector.load %arg9[%c0_6, %c0_7] : memref<16x512xbf16, #tpu.memory_space<vmem>>, vector<16x512xbf16>
    tpu.vector_store %arg9[%c0_6, %c0_7], %9 {strides = array<i32>} : memref<16x512xbf16, #tpu.memory_space<vmem>>, vector<16x512xbf16>,
    %c0_8 = arith.constant 0 : index
    %c0_9 = arith.constant 0 : index
    %11 = vector.load %arg9[%c0_8, %c0_9] : memref<16x512xbf16, #tpu.memory_space<vmem>>, vector<16x512xbf16>
    %c0_10 = arith.constant 0 : index
    %c0_11 = arith.constant 0 : index
    %12 = vector.load %arg4[%c0_10, %c0_11] : memref<512x512xbf16, #tpu.memory_space<vmem>>, vector<512x512xbf16>
    %cst_12 = arith.constant dense<0.000000e+00> : vector<16x512xf32>
    %13 = tpu.matmul %11, %12, %cst_12 {dimension_numbers = #tpu.dot_dimension_numbers<[1], [0], [0], [1], [0, 0, 1, 1], [], []>} : vector<16x512xbf16>, vector<512x512xbf16>, vector<16x512xf32> -> vector<16x512xf32>
    %c0_13 = arith.constant 0 : index
    %c0_14 = arith.constant 0 : index
    %14 = vector.load %arg5[%c0_13, %c0_14] : memref<1x512xf32, #tpu.memory_space<vmem>>, vector<1x512xf32>
    %15 = vector.broadcast %14 : vector<1x512xf32> to vector<16x512xf32>
    %16 = arith.addf %13, %15 : vector<16x512xf32>
    %cst_15 = arith.constant 0.000000e+00 : f32
    %17 = vector.broadcast %cst_15 : f32 to vector<16x512xf32>
    %18 = arith.maximumf %16, %17 : vector<16x512xf32>
    %19 = arith.truncf %18 : vector<16x512xf32> to vector<16x512xbf16>
    %c0_16 = arith.constant 0 : index
    %c0_17 = arith.constant 0 : index
    %20 = vector.load %arg9[%c0_16, %c0_17] : memref<16x512xbf16, #tpu.memory_space<vmem>>, vector<16x512xbf16>
    tpu.vector_store %arg9[%c0_16, %c0_17], %19 {strides = array<i32>} : memref<16x512xbf16, #tpu.memory_space<vmem>>, vector<16x512xbf16>,
    %c0_18 = arith.constant 0 : index
    %c0_19 = arith.constant 0 : index
    %21 = vector.load %arg9[%c0_18, %c0_19] : memref<16x512xbf16, #tpu.memory_space<vmem>>, vector<16x512xbf16>
    %c0_20 = arith.constant 0 : index
    %c0_21 = arith.constant 0 : index
    %22 = vector.load %arg6[%c0_20, %c0_21] : memref<1x512xf32, #tpu.memory_space<vmem>>, vector<1x512xf32>
    %23 = arith.extf %21 : vector<16x512xbf16> to vector<16x512xf32>
    %24 = vector.broadcast %22 : vector<1x512xf32> to vector<16x512xf32>
    %25 = arith.mulf %23, %24 : vector<16x512xf32>
    %cst_22 = arith.constant dense<0.000000e+00> : vector<16xf32>
    %26 = vector.multi_reduction <add>, %25, %cst_22 [1] : vector<16x512xf32> to vector<16xf32>
    %27 = vector.shape_cast %26 : vector<16xf32> to vector<16x1xf32>
    %c0_23 = arith.constant 0 : index
    %c0_24 = arith.constant 0 : index
    %28 = vector.load %arg7[%c0_23, %c0_24] : memref<1x1xf32, #tpu.memory_space<vmem>>, vector<1x1xf32>
    %29 = vector.broadcast %28 : vector<1x1xf32> to vector<16x1xf32>
    %30 = arith.addf %27, %29 : vector<16x1xf32>
    %c0_25 = arith.constant 0 : index
    %c0_26 = arith.constant 0 : index
    %31 = vector.load %arg8[%c0_25, %c0_26] : memref<16x1xf32, #tpu.memory_space<vmem>>, vector<16x1xf32>
    tpu.vector_store %arg8[%c0_25, %c0_26], %30 {strides = array<i32>} : memref<16x1xf32, #tpu.memory_space<vmem>>, vector<16x1xf32>,
    return
  }
  func.func @transform_0(%arg0: i32) -> (i32, i32) {
    %c0_i32 = arith.constant 0 : i32
    %c0_i32_0 = arith.constant 0 : i32
    return %arg0, %c0_i32 : i32, i32
  }
  func.func @transform_1(%arg0: i32) -> (i32, i32) {
    %c0_i32 = arith.constant 0 : i32
    %c0_i32_0 = arith.constant 0 : i32
    %c0_i32_1 = arith.constant 0 : i32
    return %c0_i32, %c0_i32_0 : i32, i32
  }
  func.func @transform_2(%arg0: i32) -> (i32, i32) {
    %c0_i32 = arith.constant 0 : i32
    %c0_i32_0 = arith.constant 0 : i32
    %c0_i32_1 = arith.constant 0 : i32
    return %c0_i32, %c0_i32_0 : i32, i32
  }
  func.func @transform_3(%arg0: i32) -> (i32, i32) {
    %c0_i32 = arith.constant 0 : i32
    %c0_i32_0 = arith.constant 0 : i32
    %c0_i32_1 = arith.constant 0 : i32
    return %c0_i32, %c0_i32_0 : i32, i32
  }
  func.func @transform_4(%arg0: i32) -> (i32, i32) {
    %c0_i32 = arith.constant 0 : i32
    %c0_i32_0 = arith.constant 0 : i32
    %c0_i32_1 = arith.constant 0 : i32
    return %c0_i32, %c0_i32_0 : i32, i32
  }
  func.func @transform_5(%arg0: i32) -> (i32, i32) {
    %c0_i32 = arith.constant 0 : i32
    %c0_i32_0 = arith.constant 0 : i32
    %c0_i32_1 = arith.constant 0 : i32
    return %c0_i32, %c0_i32_0 : i32, i32
  }
  func.func @transform_6(%arg0: i32) -> (i32, i32) {
    %c0_i32 = arith.constant 0 : i32
    %c0_i32_0 = arith.constant 0 : i32
    %c0_i32_1 = arith.constant 0 : i32
    return %c0_i32, %c0_i32_0 : i32, i32
  }
  func.func @transform_7(%arg0: i32) -> (i32, i32) {
    %c0_i32 = arith.constant 0 : i32
    %c0_i32_0 = arith.constant 0 : i32
    return %arg0, %c0_i32 : i32, i32
  }
}

</mosaic_0001>

<bundles_post_ra>
// kernel: tpu_custom_call.1
= control target key start
LH: loop header
LB: loop body
LE: loop exit
PB: predicated region body
PF: predicated region fallthrough
CT: control target
= control target key end

     0   :  { %s1980_s0 = inlined_call_operand.hbm [shape: f32[2,32], index: 0, kind: input, shape index: {}]   ;;  %s1981_s1 = inlined_call_operand.hbm [shape: bf16[32,512], index: 1, kind: input, shape index: {}]   ;;  %s1982_s2 = inlined_call_operand.vmem [shape: f32[1,512], index: 2, kind: input, shape index: {}]   ;;  %s1983_s3 = inlined_call_operand.hbm [shape: bf16[512,512], index: 3, kind: input, shape index: {}]   ;;  %s1984_s4 = inlined_call_operand.vmem [shape: f32[1,512], index: 4, kind: input, shape index: {}]   ;;  %s1985_s5 = inlined_call_operand.hbm [shape: f32[1,512], index: 5, kind: input, shape index: {}]   ;;  %s1986_s6 = inlined_call_operand.<no memory space> [shape: f32[1,1], index: 6, kind: input, shape index: {}]   ;;  %s1987_s7 = inlined_call_operand.vmem [shape: f32[2,1], index: 7, kind: output, shape index: {}]  }
   0x1   :  { %v12_v0 = vstv %s1986_s6 }
   0x2   :  { %13 = vst [vmem:[#allocation3] sm:$0x1] %v12_v0 }
   0x3   :  { %14 = vsyncpa [#allocation5], 0 }
   0x4   :  { %15 = vsyncpa [#allocation7], 0 }
   0x5   :  { %16 = vsyncpa [#allocation10], 0 }
   0x6   :  { %21 = vsyncadd [#allocation5], 224  ;;  %s1873_s26 = smov [#allocation6]  }
   0x7   :  { %s34_s27 = sshll.u32 %s1873_s26, 4  ;;  %s35_s27 = int_to_ptr.vmem [resolvable:$true] %s34_s27 }
   0x8   :  { %s1795_s28 = scalar_lea.vmem %s35_s27, 1024  ;;  %p1800_p1 = scmp.lt.s32.totalorder %s35_s27, %s35_s27 }
   0x9   :  { %p1796_p0 = scmp.ne.s32.totalorder %s35_s27, %s1795_s28  ;;  %p1801_p2 = scmp.lt.s32.totalorder %s1795_s28, %s1795_s28 }
   0xb   :  { %p1802_p3 = por %p1801_p2, %p1800_p1 }
   0xd   :  { %p1803_p4 = pnand %p1802_p3, %p1796_p0 }
   0xf   :  { %1806 = shalt.err (!%p1803_p4)
}
  0x10   :  { %s1874_s29 = smov 256   ;;  %s1875_s30 = smov 16  }
  0x11   :  { %40 = dma.hbm_to_vmem [thread:$0]  %s1981_s1, 1024, %s35_s27, [#allocation7], %s1874_s29, %s1874_s29, %s1875_s30  }
  0x12   :  { %s1876_s9 = smov [#allocation4]  }
  0x13   :  { %s22_s10 = sshll.u32 %s1876_s9, 4  ;;  %s23_s10 = int_to_ptr.vmem [resolvable:$true] %s22_s10 }
  0x14   :  { %s1815_s11 = scalar_lea.vmem %s23_s10, 32  ;;  %s1819_s12 = scalar_lea.vmem %s23_s10, 256 }
  0x15   :  { %p1816_p5 = scmp.ne.s32.totalorder %s23_s10, %s1815_s11  ;;  %p1820_p6 = scmp.lt.s32.totalorder %s23_s10, %s23_s10 }
  0x16   :  { %p1821_p7 = scmp.lt.s32.totalorder %s1819_s12, %s1815_s11 }
  0x18   :  { %p1822_p8 = por %p1821_p7, %p1820_p6 }
  0x1a   :  { %p1823_p9 = pnand %p1822_p8, %p1816_p5 }
  0x1c   :  { %1826 = shalt.err (!%p1823_p9)
}
  0x1d   :  { %s1877_s13 = smov 32   ;;  %s1878_s14 = smov 2  }
  0x1e   :  { %28 = dma.hbm_to_vmem [thread:$0]  %s1980_s0, 32, %s23_s10, [#allocation5], %s1877_s13, %s1877_s13, %s1878_s14  }
  0x1f   :  { %s1879_s17 = smov [#allocation8]   ;;  %s1880_s1 = smov [#allocation9]  }
  0x20   :  { %s48_s18 = sshll.u32 %s1879_s17, 4  ;;  %s63_s19 = sshll.u32 %s1880_s1, 4  ;;  %s49_s18 = int_to_ptr.vmem [resolvable:$true] %s48_s18  ;;  %s64_s19 = int_to_ptr.vmem [resolvable:$true] %s63_s19 }
  0x21   :  { %s1835_s20 = scalar_lea.vmem %s49_s18, 16384  ;;  %p1840_p11 = scmp.lt.s32.totalorder %s49_s18, %s49_s18 }
  0x22   :  { %p1836_p10 = scmp.ne.s32.totalorder %s49_s18, %s1835_s20  ;;  %p1841_p12 = scmp.lt.s32.totalorder %s1835_s20, %s1835_s20 }
  0x24   :  { %p1842_p13 = por %p1841_p12, %p1840_p11 }
  0x26   :  { %p1843_p0 = pnand %p1842_p13, %p1836_p10 }
  0x28   :  { %1846 = shalt.err (!%p1843_p0)
}
  0x29   :  { %54 = dma.hbm_to_vmem [thread:$0]  %s1983_s3, 16384, %s49_s18, [#allocation7], %s1874_s29, %s1874_s29, %s1875_s30  }
  0x2a   :  { %s1855_s0 = scalar_lea.vmem %s64_s19, 64  ;;  %p1860_p2 = scmp.lt.s32.totalorder %s64_s19, %s64_s19 }
  0x2b   :  { %p1856_p1 = scmp.ne.s32.totalorder %s64_s19, %s1855_s0  ;;  %p1861_p3 = scmp.lt.s32.totalorder %s1855_s0, %s1855_s0 }
  0x2d   :  { %p1862_p4 = por %p1861_p3, %p1860_p2 }
  0x2f   :  { %p1863_p5 = pnand %p1862_p4, %p1856_p1 }
  0x31   :  { %1866 = shalt.err (!%p1863_p5)
}
  0x32   :  { %66 = dma.hbm_to_vmem [thread:$0]  %s1985_s5, 64, %s64_s19, [#allocation10]  }
  0x33   :  { %1867 = dma.done.wait [#allocation5], 256  }
  0x34   :  { %1868 = vsyncadd [#allocation5], 4294967040 }
  0x35   :  { %1869 = dma.done.wait [#allocation7], 17408  }
  0x36   :  { %1870 = vsyncadd [#allocation7], 4294949888 }
  0x37   :  { %1871 = dma.done.wait [#allocation10], 64  }
  0x38   :  { %1872 = vsyncadd [#allocation10], 4294967232  ;;  %v1881_v1 = vmov 0   ;;  %v1583_v2 = vld [vmem:[#allocation6 + $0x24] ss:$16 sps:$4 sm:$0xff]   ;;  %v83_v11 = vld [vmem:[#allocation4 + $0x8] sm:$0xff] }
  0x39   :  { %191 = vmatprep.mubr.bf16.mxu0 %v1881_v1  ;;  %234 = vmatprep.mubr.bf16.mxu1 %v1881_v1  ;;  %v1585_v3 = vld [vmem:[#allocation6 + $0x2c] ss:$16 sps:$4 sm:$0xff]   ;;  %v1587_v4 = vld [vmem:[#allocation6 + $0x20] ss:$16 sps:$4 sm:$0xff]   ;;  %v1588_v5 = vld [vmem:[#allocation6 + $0x28] ss:$16 sps:$4 sm:$0xff]  }
  0x3a   :  { %171 = vmatprep.subr.bf16.mxu0 %v1583_v2  ;;  %214 = vmatprep.subr.bf16.mxu1 %v1585_v3  ;;  %v1589_v6 = vld [vmem:[#allocation6 + $0x4] ss:$16 sps:$4 sm:$0xff]   ;;  %v1591_v7 = vld [vmem:[#allocation6 + $0xc] ss:$16 sps:$4 sm:$0xff]   ;;  %v1593_v8 = vld [vmem:[#allocation6] ss:$16 sps:$4 sm:$0xff]  }
  0x3b   :  { %172 = vmatpush1.bf16.msra.mxu0 %v1587_v4  ;;  %215 = vmatpush1.bf16.msra.mxu1 %v1588_v5  ;;  %v1594_v9 = vld [vmem:[#allocation6 + $0x8] ss:$16 sps:$4 sm:$0xff]   ;;  %v82_v10 = vld [vmem:[#allocation4] sm:$0xff]  ;;  %vm155_vm0 = vcmask 261120   ;;  %vm1364_vm1 = vcmask 7168  }
  0x3c   :  { %173 = vmatprep.subr.bf16.mxu0 %v1589_v6  ;;  %216 = vmatprep.subr.bf16.mxu1 %v1591_v7  ;;  %v1595_v12 = vld [vmem:[#allocation8 + $0xe0] ss:$16 sps:$4 sm:$0xff]   ;;  %v84_v13 = vpack.c.bf16 %v83_v11, %v82_v10  ;;  %v1597_v14 = vld [vmem:[#allocation8 + $0xe4] ss:$16 sps:$4 sm:$0xff]  }
  0x3d   :  { %v1598_v15 = vld [vmem:[#allocation8 + $0x2e0] ss:$16 sps:$4 sm:$0xff]   ;;  %v1600_v16 = vld [vmem:[#allocation8 + $0x2e4] ss:$16 sps:$4 sm:$0xff]  }
  0x3e   :  { %v1603_v17 = vld [vmem:[#allocation8 + $0xc4] ss:$16 sps:$4 sm:$0xff]   ;;  %v1601_v19 = vld [vmem:[#allocation8 + $0xc0] ss:$16 sps:$4 sm:$0xff]  }
  0x3f   :  { %174 = vmatpush1.bf16.msra.mxu0 %v1593_v8  ;;  %217 = vmatpush1.bf16.msra.mxu1 %v1594_v9  ;;  %v1606_v18 = vld [vmem:[#allocation8 + $0x2c4] ss:$16 sps:$4 sm:$0xff]   ;;  %v1604_v20 = vld [vmem:[#allocation8 + $0x2c0] ss:$16 sps:$4 sm:$0xff]  }
  0x40   :  { %1095 = vmatprep.subr.bf16.mxu0 %v1597_v14  ;;  %1138 = vmatprep.subr.bf16.mxu1 %v1600_v16  ;;  %v1609_v21 = vld [vmem:[#allocation8 + $0xa4] ss:$16 sps:$4 sm:$0xff]   ;;  %v1607_v23 = vld [vmem:[#allocation8 + $0xa0] ss:$16 sps:$4 sm:$0xff]   ;;  %v1696_v14 = vld [vmem:[#allocation8 + $0x2ec] ss:$16 sps:$4 sm:$0xff]  }
  0x41   :  { %v1612_v22 = vld [vmem:[#allocation8 + $0x2a4] ss:$16 sps:$4 sm:$0xff]   ;;  %v1610_v24 = vld [vmem:[#allocation8 + $0x2a0] ss:$16 sps:$4 sm:$0xff]  }
  0x42   :  { %1419 = vmatmul.mubr.msk.bf16.vlgmr.msra.gmra.mxu0 %vm155_vm0, %v84_v13  ;;  %1420 = vmatmul.mubr.msk.bf16.vlgmr.msra.gmra.mxu1 %vm155_vm0, %v84_v13  ;;  %v1615_v25 = vld [vmem:[#allocation8 + $0x84] ss:$16 sps:$4 sm:$0xff]   ;;  %v1613_v27 = vld [vmem:[#allocation8 + $0x80] ss:$16 sps:$4 sm:$0xff]   ;;  %v1693_v13 = vld [vmem:[#allocation8 + $0xec] ss:$16 sps:$4 sm:$0xff]  }
  0x43   :  { %1096 = vmatpush1.bf16.msra.mxu0 %v1595_v12  ;;  %1139 = vmatpush1.bf16.msra.mxu1 %v1598_v15  ;;  %v1618_v26 = vld [vmem:[#allocation8 + $0x284] ss:$16 sps:$4 sm:$0xff]   ;;  %v1616_v28 = vld [vmem:[#allocation8 + $0x280] ss:$16 sps:$4 sm:$0xff]   ;;  %v95_v15 = vlaneseq }
  0x44   :  { %1097 = vmatprep.subr.bf16.mxu0 %v1603_v17  ;;  %1140 = vmatprep.subr.bf16.mxu1 %v1606_v18  ;;  %v1621_v29 = vld [vmem:[#allocation8 + $0x64] ss:$16 sps:$4 sm:$0xff]   ;;  %v1619_v31 = vld [vmem:[#allocation8 + $0x60] ss:$16 sps:$4 sm:$0xff]  }
  0x45   :  { %v1624_v30 = vld [vmem:[#allocation8 + $0x264] ss:$16 sps:$4 sm:$0xff]   ;;  %v1622_v32 = vld [vmem:[#allocation8 + $0x260] ss:$16 sps:$4 sm:$0xff]   ;;  %v96_v16 = vshrl.u32 %v95_v15, 7 }
  0x46   :  { %v1627_v33 = vld [vmem:[#allocation8 + $0x44] ss:$16 sps:$4 sm:$0xff]   ;;  %v1625_v35 = vld [vmem:[#allocation8 + $0x40] ss:$16 sps:$4 sm:$0xff]   ;;  %v1730_v15 = vld [vmem:[#allocation8 + $0x228] ss:$16 sps:$4 sm:$0xff]  }
  0x47   :  { %1098 = vmatpush1.bf16.msra.mxu0 %v1601_v19  ;;  %1141 = vmatpush1.bf16.msra.mxu1 %v1604_v20  ;;  %v1630_v34 = vld [vmem:[#allocation8 + $0x244] ss:$16 sps:$4 sm:$0xff]   ;;  %v1628_v36 = vld [vmem:[#allocation8 + $0x240] ss:$16 sps:$4 sm:$0xff]   ;;  %v1943_v17 = vsub.s32 1, %v96_v16  ;;  %v1945_v18 = vsub.s32 3, %v96_v16 }
  0x48   :  { %1099 = vmatprep.subr.bf16.mxu0 %v1609_v21  ;;  %1142 = vmatprep.subr.bf16.mxu1 %v1612_v22  ;;  %v1633_v37 = vld [vmem:[#allocation8 + $0x24] ss:$16 sps:$4 sm:$0xff]   ;;  %v1631_v39 = vld [vmem:[#allocation8 + $0x20] ss:$16 sps:$4 sm:$0xff]   ;;  %v1947_v19 = vsub.s32 0, %v96_v16  ;;  %v1949_v20 = vsub.s32 2, %v96_v16 }
  0x49   :  { %v1636_v38 = vld [vmem:[#allocation8 + $0x224] ss:$16 sps:$4 sm:$0xff]   ;;  %v1634_v40 = vld [vmem:[#allocation8 + $0x220] ss:$16 sps:$4 sm:$0xff]   ;;  %v1735_v16 = vld [vmem:[#allocation8 + $0xc] ss:$16 sps:$4 sm:$0xff]  }
  0x4a   :  { %v1639_v41 = vld [vmem:[#allocation8 + $0x4] ss:$16 sps:$4 sm:$0xff]   ;;  %v1637_v43 = vld [vmem:[#allocation8] ss:$16 sps:$4 sm:$0xff]  }
  0x4b   :  { %1100 = vmatpush1.bf16.msra.mxu0 %v1607_v23  ;;  %1143 = vmatpush1.bf16.msra.mxu1 %v1610_v24  ;;  %v1642_v42 = vld [vmem:[#allocation8 + $0x204] ss:$16 sps:$4 sm:$0xff]   ;;  %v1640_v44 = vld [vmem:[#allocation8 + $0x200] ss:$16 sps:$4 sm:$0xff]  }
  0x4c   :  { %1101 = vmatprep.subr.bf16.mxu0 %v1615_v25  ;;  %1144 = vmatprep.subr.bf16.mxu1 %v1618_v26  ;;  %v1645_v45 = vld [vmem:[#allocation8 + $0x1e4] ss:$16 sps:$4 sm:$0xff]   ;;  %v1643_v47 = vld [vmem:[#allocation8 + $0x1e0] ss:$16 sps:$4 sm:$0xff]  }
  0x4d   :  { %v1648_v46 = vld [vmem:[#allocation8 + $0x3e4] ss:$16 sps:$4 sm:$0xff]   ;;  %v1646_v48 = vld [vmem:[#allocation8 + $0x3e0] ss:$16 sps:$4 sm:$0xff]  }
  0x4e   :  { %v1651_v49 = vld [vmem:[#allocation8 + $0x1c4] ss:$16 sps:$4 sm:$0xff]   ;;  %v1649_v51 = vld [vmem:[#allocation8 + $0x1c0] ss:$16 sps:$4 sm:$0xff]  }
  0x4f   :  { %1102 = vmatpush1.bf16.msra.mxu0 %v1613_v27  ;;  %1145 = vmatpush1.bf16.msra.mxu1 %v1616_v28  ;;  %v1654_v50 = vld [vmem:[#allocation8 + $0x3c4] ss:$16 sps:$4 sm:$0xff]   ;;  %v1652_v52 = vld [vmem:[#allocation8 + $0x3c0] ss:$16 sps:$4 sm:$0xff]  }
  0x50   :  { %1103 = vmatprep.subr.bf16.mxu0 %v1621_v29  ;;  %1146 = vmatprep.subr.bf16.mxu1 %v1624_v30  ;;  %v1657_v53 = vld [vmem:[#allocation8 + $0x1a4] ss:$16 sps:$4 sm:$0xff]   ;;  %v1655_v55 = vld [vmem:[#allocation8 + $0x1a0] ss:$16 sps:$4 sm:$0xff]  }
  0x51   :  { %v1660_v54 = vld [vmem:[#allocation8 + $0x3a4] ss:$16 sps:$4 sm:$0xff]   ;;  %v1658_v56 = vld [vmem:[#allocation8 + $0x3a0] ss:$16 sps:$4 sm:$0xff]  }
  0x52   :  { %v1663_v57 = vld [vmem:[#allocation8 + $0x184] ss:$16 sps:$4 sm:$0xff]   ;;  %v1661_v59 = vld [vmem:[#allocation8 + $0x180] ss:$16 sps:$4 sm:$0xff]  }
  0x53   :  { %1104 = vmatpush1.bf16.msra.mxu0 %v1619_v31  ;;  %1147 = vmatpush1.bf16.msra.mxu1 %v1622_v32  ;;  %v1666_v58 = vld [vmem:[#allocation8 + $0x384] ss:$16 sps:$4 sm:$0xff]   ;;  %v1664_v60 = vld [vmem:[#allocation8 + $0x380] ss:$16 sps:$4 sm:$0xff]  }
  0x54   :  { %1105 = vmatprep.subr.bf16.mxu0 %v1627_v33  ;;  %1148 = vmatprep.subr.bf16.mxu1 %v1630_v34  ;;  %v1669_v61 = vld [vmem:[#allocation8 + $0x164] ss:$16 sps:$4 sm:$0xff]   ;;  %v1667_v63 = vld [vmem:[#allocation8 + $0x160] ss:$16 sps:$4 sm:$0xff]  }
  0x55   :  { %v1672_v62 = vld [vmem:[#allocation8 + $0x364] ss:$16 sps:$4 sm:$0xff]   ;;  %v1670_v0 = vld [vmem:[#allocation8 + $0x360] ss:$16 sps:$4 sm:$0xff]  }
  0x56   :  { %v1675_v1 = vld [vmem:[#allocation8 + $0x144] ss:$16 sps:$4 sm:$0xff]   ;;  %v1673_v3 = vld [vmem:[#allocation8 + $0x140] ss:$16 sps:$4 sm:$0xff]  }
  0x57   :  { %1106 = vmatpush1.bf16.msra.mxu0 %v1625_v35  ;;  %1149 = vmatpush1.bf16.msra.mxu1 %v1628_v36  ;;  %v1678_v2 = vld [vmem:[#allocation8 + $0x344] ss:$16 sps:$4 sm:$0xff]   ;;  %v1676_v4 = vld [vmem:[#allocation8 + $0x340] ss:$16 sps:$4 sm:$0xff]  }
  0x58   :  { %1107 = vmatprep.subr.bf16.mxu0 %v1633_v37  ;;  %1150 = vmatprep.subr.bf16.mxu1 %v1636_v38  ;;  %v1681_v5 = vld [vmem:[#allocation8 + $0x124] ss:$16 sps:$4 sm:$0xff]   ;;  %v1679_v7 = vld [vmem:[#allocation8 + $0x120] ss:$16 sps:$4 sm:$0xff]  }
  0x59   :  { %v1684_v6 = vld [vmem:[#allocation8 + $0x324] ss:$16 sps:$4 sm:$0xff]   ;;  %v1682_v8 = vld [vmem:[#allocation8 + $0x320] ss:$16 sps:$4 sm:$0xff]  }
  0x5a   :  { %v1687_v9 = vld [vmem:[#allocation8 + $0x104] ss:$16 sps:$4 sm:$0xff]   ;;  %v1685_v11 = vld [vmem:[#allocation8 + $0x100] ss:$16 sps:$4 sm:$0xff]  }
  0x5b   :  { %1108 = vmatpush1.bf16.msra.mxu0 %v1631_v39  ;;  %1151 = vmatpush1.bf16.msra.mxu1 %v1634_v40  ;;  %v1690_v10 = vld [vmem:[#allocation8 + $0x304] ss:$16 sps:$4 sm:$0xff]   ;;  %v1688_v12 = vld [vmem:[#allocation8 + $0x300] ss:$16 sps:$4 sm:$0xff]  }
  0x5c   :  { %1109 = vmatprep.subr.bf16.mxu0 %v1639_v41  ;;  %1152 = vmatprep.subr.bf16.mxu1 %v1642_v42  ;;  %v93_v21 = vld [vmem:[%s1982_s2] sm:$0xf] }
  0x5d   :  { %v102_v24 = vrot.slane %v93_v21, %v1943_v17  ;;  %v110_v25 = vrot.slane %v93_v21, %v1945_v18  ;;  %v98_v26 = vrot.slane %v93_v21, %v1947_v19  ;;  %v106_v27 = vrot.slane %v93_v21, %v1949_v20  ;;  %v1738_v21 = vld [vmem:[#allocation8 + $0x20c] ss:$16 sps:$4 sm:$0xff]  }
  0x5f   :  { %1110 = vmatpush1.bf16.msra.mxu0 %v1637_v43  ;;  %1153 = vmatpush1.bf16.msra.mxu1 %v1640_v44 }
  0x60   :  { %1111 = vmatprep.subr.bf16.mxu0 %v1645_v45  ;;  %1154 = vmatprep.subr.bf16.mxu1 %v1648_v46 }
  0x63   :  { %1112 = vmatpush2.bf16.msra.mxu0 %v1643_v47  ;;  %1155 = vmatpush2.bf16.msra.mxu1 %v1646_v48 }
  0x64   :  { %1113 = vmatprep.subr.bf16.mxu0 %v1651_v49  ;;  %1156 = vmatprep.subr.bf16.mxu1 %v1654_v50 }
  0x67   :  { %1114 = vmatpush2.bf16.msra.mxu0 %v1649_v51  ;;  %1157 = vmatpush2.bf16.msra.mxu1 %v1652_v52  ;;  %v1691_v52 = vld [vmem:[#allocation8 + $0xe8] ss:$16 sps:$4 sm:$0xff]  }
  0x68   :  { %1115 = vmatprep.subr.bf16.mxu0 %v1657_v53  ;;  %1158 = vmatprep.subr.bf16.mxu1 %v1660_v54  ;;  %v1694_v53 = vld [vmem:[#allocation8 + $0x2e8] ss:$16 sps:$4 sm:$0xff]  }
  0x6b   :  { %1116 = vmatpush2.bf16.msra.mxu0 %v1655_v55  ;;  %1159 = vmatpush2.bf16.msra.mxu1 %v1658_v56  ;;  %v1699_v56 = vld [vmem:[#allocation8 + $0xcc] ss:$16 sps:$4 sm:$0xff]  }
  0x6c   :  { %1117 = vmatprep.subr.bf16.mxu0 %v1663_v57  ;;  %1160 = vmatprep.subr.bf16.mxu1 %v1666_v58  ;;  %v1702_v57 = vld [vmem:[#allocation8 + $0x2cc] ss:$16 sps:$4 sm:$0xff]   ;;  %v1697_v58 = vld [vmem:[#allocation8 + $0xc8] ss:$16 sps:$4 sm:$0xff]  }
  0x6f   :  { %1118 = vmatpush2.bf16.msra.mxu0 %v1661_v59  ;;  %1161 = vmatpush2.bf16.msra.mxu1 %v1664_v60  ;;  %v1700_v59 = vld [vmem:[#allocation8 + $0x2c8] ss:$16 sps:$4 sm:$0xff]   ;;  %v1705_v60 = vld [vmem:[#allocation8 + $0xac] ss:$16 sps:$4 sm:$0xff]  }
  0x70   :  { %1119 = vmatprep.subr.bf16.mxu0 %v1669_v61  ;;  %1162 = vmatprep.subr.bf16.mxu1 %v1672_v62  ;;  %v1708_v61 = vld [vmem:[#allocation8 + $0x2ac] ss:$16 sps:$4 sm:$0xff]   ;;  %v1703_v62 = vld [vmem:[#allocation8 + $0xa8] ss:$16 sps:$4 sm:$0xff]  }
  0x73   :  { %1120 = vmatpush2.bf16.msra.mxu0 %v1667_v63  ;;  %1163 = vmatpush2.bf16.msra.mxu1 %v1670_v0  ;;  %v1706_v63 = vld [vmem:[#allocation8 + $0x2a8] ss:$16 sps:$4 sm:$0xff]   ;;  %v1711_v0 = vld [vmem:[#allocation8 + $0x8c] ss:$16 sps:$4 sm:$0xff]  }
  0x74   :  { %1121 = vmatprep.subr.bf16.mxu0 %v1675_v1  ;;  %1164 = vmatprep.subr.bf16.mxu1 %v1678_v2  ;;  %v1714_v1 = vld [vmem:[#allocation8 + $0x28c] ss:$16 sps:$4 sm:$0xff]   ;;  %v1709_v2 = vld [vmem:[#allocation8 + $0x88] ss:$16 sps:$4 sm:$0xff]  }
  0x77   :  { %1122 = vmatpush2.bf16.msra.mxu0 %v1673_v3  ;;  %1165 = vmatpush2.bf16.msra.mxu1 %v1676_v4  ;;  %v1712_v3 = vld [vmem:[#allocation8 + $0x288] ss:$16 sps:$4 sm:$0xff]   ;;  %v1717_v4 = vld [vmem:[#allocation8 + $0x6c] ss:$16 sps:$4 sm:$0xff]  }
  0x78   :  { %1123 = vmatprep.subr.bf16.mxu0 %v1681_v5  ;;  %1166 = vmatprep.subr.bf16.mxu1 %v1684_v6  ;;  %v1720_v5 = vld [vmem:[#allocation8 + $0x26c] ss:$16 sps:$4 sm:$0xff]   ;;  %v1715_v6 = vld [vmem:[#allocation8 + $0x68] ss:$16 sps:$4 sm:$0xff]  }
  0x7b   :  { %1124 = vmatpush2.bf16.msra.mxu0 %v1679_v7  ;;  %1167 = vmatpush2.bf16.msra.mxu1 %v1682_v8  ;;  %v1718_v7 = vld [vmem:[#allocation8 + $0x268] ss:$16 sps:$4 sm:$0xff]   ;;  %v1723_v8 = vld [vmem:[#allocation8 + $0x4c] ss:$16 sps:$4 sm:$0xff]  }
  0x7c   :  { %1125 = vmatprep.subr.bf16.mxu0 %v1687_v9  ;;  %1168 = vmatprep.subr.bf16.mxu1 %v1690_v10  ;;  %v1726_v9 = vld [vmem:[#allocation8 + $0x24c] ss:$16 sps:$4 sm:$0xff]   ;;  %v1721_v10 = vld [vmem:[#allocation8 + $0x48] ss:$16 sps:$4 sm:$0xff]  }
  0x7f   :  { %1126 = vmatpush2.bf16.msra.mxu0 %v1685_v11  ;;  %1169 = vmatpush2.bf16.msra.mxu1 %v1688_v12  ;;  %v1724_v11 = vld [vmem:[#allocation8 + $0x248] ss:$16 sps:$4 sm:$0xff]   ;;  %v1729_v12 = vld [vmem:[#allocation8 + $0x2c] ss:$16 sps:$4 sm:$0xff]  }
  0x80   :  { %1181 = vmatprep.subr.bf16.mxu0 %v1693_v13  ;;  %1224 = vmatprep.subr.bf16.mxu1 %v1696_v14  ;;  %v1732_v13 = vld [vmem:[#allocation8 + $0x22c] ss:$16 sps:$4 sm:$0xff]   ;;  %v1727_v14 = vld [vmem:[#allocation8 + $0x28] ss:$16 sps:$4 sm:$0xff]  }
 0x102   :  { %v193_v22 = vpop.f32.mrf.mxu0  ;;  %v236_v23 = vpop.f32.mrf.mxu1 }
 0x103   :  { %v194_v36 = vadd.f32 %v193_v22, %v98_v26  ;;  %v237_v37 = vadd.f32 %v236_v23, %v106_v27  ;;  %v1733_v22 = vld [vmem:[#allocation8 + $0x8] ss:$16 sps:$4 sm:$0xff]  }
 0x104   :  { %v195_v28 = vpop.f32.mrf.mxu0  ;;  %v238_v29 = vpop.f32.mrf.mxu1  ;;  %v1736_v23 = vld [vmem:[#allocation8 + $0x208] ss:$16 sps:$4 sm:$0xff]  }
 0x105   :  { %v196_v32 = vadd.f32 %v195_v28, %v102_v24  ;;  %v239_v33 = vadd.f32 %v238_v29, %v110_v25  ;;  %v245_v48 = vmax.f32 %v194_v36, 0.0  ;;  %v247_v49 = vmax.f32 %v237_v37, 0.0  ;;  %v1747_v28 = vld [vmem:[#allocation8 + $0x1cc] ss:$16 sps:$4 sm:$0xff]  }
 0x106   :  { %v197_v30 = vpop.f32.mrf.mxu0  ;;  %v240_v31 = vpop.f32.mrf.mxu1  ;;  %v1750_v29 = vld [vmem:[#allocation8 + $0x3cc] ss:$16 sps:$4 sm:$0xff]  }
 0x107   :  { %v198_v34 = vadd.f32 %v197_v30, %v98_v26  ;;  %v241_v35 = vadd.f32 %v240_v31, %v106_v27  ;;  %v246_v44 = vmax.f32 %v196_v32, 0.0  ;;  %v248_v45 = vmax.f32 %v239_v33, 0.0  ;;  %v1739_v26 = vld [vmem:[#allocation8 + $0x1e8] ss:$16 sps:$4 sm:$0xff]   ;;  %v1753_v32 = vld [vmem:[#allocation8 + $0x1ac] ss:$16 sps:$4 sm:$0xff]  }
 0x108   :  { %v199_v38 = vpop.f32.mrf.mxu0  ;;  %v242_v39 = vpop.f32.mrf.mxu1  ;;  %v1742_v27 = vld [vmem:[#allocation8 + $0x3e8] ss:$16 sps:$4 sm:$0xff]   ;;  %v1756_v33 = vld [vmem:[#allocation8 + $0x3ac] ss:$16 sps:$4 sm:$0xff]  }
 0x109   :  { %v200_v40 = vadd.f32 %v199_v38, %v102_v24  ;;  %v243_v41 = vadd.f32 %v242_v39, %v110_v25  ;;  %v249_v42 = vmax.f32 %v198_v34, 0.0  ;;  %v251_v43 = vmax.f32 %v241_v35, 0.0  ;;  %v1741_v24 = vld [vmem:[#allocation8 + $0x1ec] ss:$16 sps:$4 sm:$0xff]   ;;  %v1745_v30 = vld [vmem:[#allocation8 + $0x1c8] ss:$16 sps:$4 sm:$0xff]  }
 0x10a   :  { %v1744_v25 = vld [vmem:[#allocation8 + $0x3ec] ss:$16 sps:$4 sm:$0xff]   ;;  %v1748_v31 = vld [vmem:[#allocation8 + $0x3c8] ss:$16 sps:$4 sm:$0xff]  }
 0x10b   :  { %v250_v46 = vmax.f32 %v200_v40, 0.0  ;;  %v252_v47 = vmax.f32 %v243_v41, 0.0  ;;  %v1958_v54 = vpack.c.bf16 %v249_v42, %v245_v48  ;;  %v1960_v55 = vpack.c.bf16 %v251_v43, %v247_v49  ;;  %v1751_v34 = vld [vmem:[#allocation8 + $0x1a8] ss:$16 sps:$4 sm:$0xff]   ;;  %v1759_v36 = vld [vmem:[#allocation8 + $0x18c] ss:$16 sps:$4 sm:$0xff]  }
 0x10c   :  { %v1754_v35 = vld [vmem:[#allocation8 + $0x3a8] ss:$16 sps:$4 sm:$0xff]   ;;  %v1762_v37 = vld [vmem:[#allocation8 + $0x38c] ss:$16 sps:$4 sm:$0xff]  }
 0x10d   :  { %v1571_v50 = vpack.c.bf16 %v250_v46, %v246_v44  ;;  %v1573_v51 = vpack.c.bf16 %v252_v47, %v248_v45  ;;  %v1757_v38 = vld [vmem:[#allocation8 + $0x188] ss:$16 sps:$4 sm:$0xff]   ;;  %v1765_v40 = vld [vmem:[#allocation8 + $0x16c] ss:$16 sps:$4 sm:$0xff]  }
 0x10e   :  { %v1760_v39 = vld [vmem:[#allocation8 + $0x388] ss:$16 sps:$4 sm:$0xff]   ;;  %v1768_v41 = vld [vmem:[#allocation8 + $0x36c] ss:$16 sps:$4 sm:$0xff]  }
 0x10f   :  { %1127 = vmatprep.mubr.bf16.mxu0 %v1571_v50  ;;  %1170 = vmatprep.mubr.bf16.mxu1 %v1573_v51  ;;  %v1763_v42 = vld [vmem:[#allocation8 + $0x168] ss:$16 sps:$4 sm:$0xff]   ;;  %v1771_v44 = vld [vmem:[#allocation8 + $0x14c] ss:$16 sps:$4 sm:$0xff]  }
 0x110   :  { %1128 = vmatmul.mubr.bf16.vlgmr.msra.gmra.mxu0 %v1958_v54  ;;  %1171 = vmatmul.mubr.bf16.vlgmr.msra.gmra.mxu1 %v1960_v55  ;;  %v1766_v43 = vld [vmem:[#allocation8 + $0x368] ss:$16 sps:$4 sm:$0xff]   ;;  %v1774_v45 = vld [vmem:[#allocation8 + $0x34c] ss:$16 sps:$4 sm:$0xff]  }
 0x111   :  { %1182 = vmatpush1.bf16.msra.mxu0 %v1691_v52  ;;  %1225 = vmatpush1.bf16.msra.mxu1 %v1694_v53  ;;  %v1769_v46 = vld [vmem:[#allocation8 + $0x148] ss:$16 sps:$4 sm:$0xff]   ;;  %v1777_v48 = vld [vmem:[#allocation8 + $0x12c] ss:$16 sps:$4 sm:$0xff]  }
 0x112   :  { %1213 = vmatprep.mubr.bf16.mxu0 %v1571_v50  ;;  %1256 = vmatprep.mubr.bf16.mxu1 %v1573_v51  ;;  %v1772_v47 = vld [vmem:[#allocation8 + $0x348] ss:$16 sps:$4 sm:$0xff]   ;;  %v1780_v49 = vld [vmem:[#allocation8 + $0x32c] ss:$16 sps:$4 sm:$0xff]  }
 0x113   :  { %1183 = vmatprep.subr.bf16.mxu0 %v1699_v56  ;;  %1226 = vmatprep.subr.bf16.mxu1 %v1702_v57  ;;  %v1775_v50 = vld [vmem:[#allocation8 + $0x128] ss:$16 sps:$4 sm:$0xff]   ;;  %v1783_v52 = vld [vmem:[#allocation8 + $0x10c] ss:$16 sps:$4 sm:$0xff]  }
 0x114   :  { %v1778_v51 = vld [vmem:[#allocation8 + $0x328] ss:$16 sps:$4 sm:$0xff]   ;;  %v1786_v53 = vld [vmem:[#allocation8 + $0x30c] ss:$16 sps:$4 sm:$0xff]  }
 0x115   :  { %1184 = vmatpush1.bf16.msra.mxu0 %v1697_v58  ;;  %1227 = vmatpush1.bf16.msra.mxu1 %v1700_v59  ;;  %v1781_v56 = vld [vmem:[#allocation8 + $0x108] ss:$16 sps:$4 sm:$0xff]  }
 0x116   :  { %1185 = vmatprep.subr.bf16.mxu0 %v1705_v60  ;;  %1228 = vmatprep.subr.bf16.mxu1 %v1708_v61  ;;  %v1784_v57 = vld [vmem:[#allocation8 + $0x308] ss:$16 sps:$4 sm:$0xff]   ;;  %v413_v60 = vld [vmem:[%s1984_s4] sm:$0xf] }
 0x119   :  { %1186 = vmatpush1.bf16.msra.mxu0 %v1703_v62  ;;  %1229 = vmatpush1.bf16.msra.mxu1 %v1706_v63  ;;  %v422_v62 = vrot.slane %v413_v60, %v1943_v17  ;;  %v418_v63 = vrot.slane %v413_v60, %v1947_v19 }
 0x11a   :  { %1187 = vmatprep.subr.bf16.mxu0 %v1711_v0  ;;  %1230 = vmatprep.subr.bf16.mxu1 %v1714_v1 }
 0x11d   :  { %1188 = vmatpush1.bf16.msra.mxu0 %v1709_v2  ;;  %1231 = vmatpush1.bf16.msra.mxu1 %v1712_v3 }
 0x11e   :  { %1189 = vmatprep.subr.bf16.mxu0 %v1717_v4  ;;  %1232 = vmatprep.subr.bf16.mxu1 %v1720_v5 }
 0x121   :  { %1190 = vmatpush1.bf16.msra.mxu0 %v1715_v6  ;;  %1233 = vmatpush1.bf16.msra.mxu1 %v1718_v7 }
 0x122   :  { %1191 = vmatprep.subr.bf16.mxu0 %v1723_v8  ;;  %1234 = vmatprep.subr.bf16.mxu1 %v1726_v9 }
 0x125   :  { %1192 = vmatpush1.bf16.msra.mxu0 %v1721_v10  ;;  %1235 = vmatpush1.bf16.msra.mxu1 %v1724_v11  ;;  %v426_v11 = vrot.slane %v413_v60, %v1949_v20 }
 0x126   :  { %1193 = vmatprep.subr.bf16.mxu0 %v1729_v12  ;;  %1236 = vmatprep.subr.bf16.mxu1 %v1732_v13 }
 0x129   :  { %1194 = vmatpush1.bf16.msra.mxu0 %v1727_v14  ;;  %1237 = vmatpush1.bf16.msra.mxu1 %v1730_v15  ;;  %v430_v14 = vrot.slane %v413_v60, %v1945_v18 }
 0x12a   :  { %1195 = vmatprep.subr.bf16.mxu0 %v1735_v16  ;;  %1238 = vmatprep.subr.bf16.mxu1 %v1738_v21 }
 0x12d   :  { %1196 = vmatpush1.bf16.msra.mxu0 %v1733_v22  ;;  %1239 = vmatpush1.bf16.msra.mxu1 %v1736_v23  ;;  %v1307_v23 = vld [vmem:[#allocation9] sm:$0xf] }
 0x12e   :  { %1197 = vmatprep.subr.bf16.mxu0 %v1741_v24  ;;  %1240 = vmatprep.subr.bf16.mxu1 %v1744_v25 }
 0x131   :  { %1198 = vmatpush2.bf16.msra.mxu0 %v1739_v26  ;;  %1241 = vmatpush2.bf16.msra.mxu1 %v1742_v27 }
 0x132   :  { %1199 = vmatprep.subr.bf16.mxu0 %v1747_v28  ;;  %1242 = vmatprep.subr.bf16.mxu1 %v1750_v29 }
 0x135   :  { %1200 = vmatpush2.bf16.msra.mxu0 %v1745_v30  ;;  %1243 = vmatpush2.bf16.msra.mxu1 %v1748_v31 }
 0x136   :  { %1201 = vmatprep.subr.bf16.mxu0 %v1753_v32  ;;  %1244 = vmatprep.subr.bf16.mxu1 %v1756_v33  ;;  %v1320_v32 = vrot.slane %v1307_v23, %v1947_v19  ;;  %v1324_v33 = vrot.slane %v1307_v23, %v1943_v17  ;;  %v1332_v17 = vrot.slane %v1307_v23, %v1945_v18 }
 0x139   :  { %1202 = vmatpush2.bf16.msra.mxu0 %v1751_v34  ;;  %1245 = vmatpush2.bf16.msra.mxu1 %v1754_v35 }
 0x13a   :  { %1203 = vmatprep.subr.bf16.mxu0 %v1759_v36  ;;  %1246 = vmatprep.subr.bf16.mxu1 %v1762_v37 }
 0x13d   :  { %1204 = vmatpush2.bf16.msra.mxu0 %v1757_v38  ;;  %1247 = vmatpush2.bf16.msra.mxu1 %v1760_v39 }
 0x13e   :  { %1205 = vmatprep.subr.bf16.mxu0 %v1765_v40  ;;  %1248 = vmatprep.subr.bf16.mxu1 %v1768_v41 }
 0x141   :  { %1206 = vmatpush2.bf16.msra.mxu0 %v1763_v42  ;;  %1249 = vmatpush2.bf16.msra.mxu1 %v1766_v43 }
 0x142   :  { %1207 = vmatprep.subr.bf16.mxu0 %v1771_v44  ;;  %1250 = vmatprep.subr.bf16.mxu1 %v1774_v45  ;;  %v1328_v45 = vrot.slane %v1307_v23, %v1949_v20 }
 0x145   :  { %1208 = vmatpush2.bf16.msra.mxu0 %v1769_v46  ;;  %1251 = vmatpush2.bf16.msra.mxu1 %v1772_v47 }
 0x146   :  { %1209 = vmatprep.subr.bf16.mxu0 %v1777_v48  ;;  %1252 = vmatprep.subr.bf16.mxu1 %v1780_v49 }
 0x149   :  { %1210 = vmatpush2.bf16.msra.mxu0 %v1775_v50  ;;  %1253 = vmatpush2.bf16.msra.mxu1 %v1778_v51 }
 0x14a   :  { %1211 = vmatprep.subr.bf16.mxu0 %v1783_v52  ;;  %1254 = vmatprep.subr.bf16.mxu1 %v1786_v53 }
 0x14d   :  { %1212 = vmatpush2.bf16.msra.mxu0 %v1781_v56  ;;  %1255 = vmatpush2.bf16.msra.mxu1 %v1784_v57 }
 0x150   :  { %1214 = vmatmul.mubr.bf16.vlgmr.msra.gmra.mxu0 %v1958_v54  ;;  %1257 = vmatmul.mubr.bf16.vlgmr.msra.gmra.mxu1 %v1960_v55 }
 0x1d0   :  { %v1129_v58 = vpop.f32.mrf.mxu0  ;;  %v1172_v61 = vpop.f32.mrf.mxu1 }
 0x1d1   :  { %v1130_v3 = vadd.f32 %v1129_v58, %v418_v63 }
 0x1d2   :  { %v1131_v59 = vpop.f32.mrf.mxu0  ;;  %v1174_v2 = vpop.f32.mrf.mxu1 }
 0x1d3   :  { %v1132_v1 = vadd.f32 %v1131_v59, %v422_v62  ;;  %v1173_v55 = vadd.f32 %v1172_v61, %v1130_v3 }
 0x1d4   :  { %v1133_v0 = vpop.f32.mrf.mxu0  ;;  %v1176_v54 = vpop.f32.mrf.mxu1 }
 0x1d5   :  { %v1175_v5 = vadd.f32 %v1174_v2, %v1132_v1  ;;  %v1134_v7 = vadd.f32 %v1133_v0, %v418_v63  ;;  %v1267_v12 = vmax.f32 %v1173_v55, 0.0 }
 0x1d6   :  { %v1135_v4 = vpop.f32.mrf.mxu0  ;;  %v1178_v9 = vpop.f32.mrf.mxu1 }
 0x1d7   :  { %v1136_v6 = vadd.f32 %v1135_v4, %v422_v62  ;;  %v1268_v8 = vmax.f32 %v1175_v5, 0.0  ;;  %v1177_v13 = vadd.f32 %v1176_v54, %v1134_v7  ;;  %v1561_v54 = vld [vmem:[#allocation3] ss:$0 sm:$0xff] }
 0x1d9   :  { %v1179_v10 = vadd.f32 %v1178_v9, %v1136_v6  ;;  %v1566_v15 = vpack.c.bf16 %v1268_v8, %v1267_v12  ;;  %v1271_v27 = vmax.f32 %v1177_v13, 0.0 }
 0x1db   :  { %v1272_v22 = vmax.f32 %v1179_v10, 0.0  ;;  %v1308_v30 = vunpack.c.l.bf16 %v1566_v15  ;;  %v1309_v31 = vunpack.c.h.bf16 %v1566_v15 }
 0x1dd   :  { %v1568_v36 = vpack.c.bf16 %v1272_v22, %v1271_v27  ;;  %v1337_v46 = vmul.f32 %v1320_v32, %v1308_v30  ;;  %v1338_v47 = vmul.f32 %v1324_v33, %v1309_v31 }
 0x1df   :  { %v1312_v48 = vunpack.c.l.bf16 %v1568_v36  ;;  %v1313_v49 = vunpack.c.h.bf16 %v1568_v36  ;;  %v1345_v57 = vadd.f32 %v1338_v47, %v1337_v46 }
 0x1e1   :  { %v1341_v58 = vmul.f32 %v1320_v32, %v1312_v48  ;;  %v1342_v59 = vmul.f32 %v1324_v33, %v1313_v49 }
 0x1e3   :  { %v1350_v3 = vadd.f32 %v1342_v59, %v1341_v58 }
 0x210   :  { %v1215_v16 = vpop.f32.mrf.mxu0  ;;  %v1258_v21 = vpop.f32.mrf.mxu1 }
 0x211   :  { %v1216_v24 = vadd.f32 %v1215_v16, %v426_v11 }
 0x212   :  { %v1217_v25 = vpop.f32.mrf.mxu0  ;;  %v1260_v26 = vpop.f32.mrf.mxu1 }
 0x213   :  { %v1259_v28 = vadd.f32 %v1258_v21, %v1216_v24  ;;  %v1218_v29 = vadd.f32 %v1217_v25, %v430_v14 }
 0x214   :  { %v1219_v34 = vpop.f32.mrf.mxu0  ;;  %v1262_v35 = vpop.f32.mrf.mxu1 }
 0x215   :  { %v1261_v37 = vadd.f32 %v1260_v26, %v1218_v29  ;;  %v1220_v38 = vadd.f32 %v1219_v34, %v426_v11  ;;  %v1269_v40 = vmax.f32 %v1259_v28, 0.0 }
 0x216   :  { %v1221_v39 = vpop.f32.mrf.mxu0  ;;  %v1264_v44 = vpop.f32.mrf.mxu1 }
 0x217   :  { %v1270_v41 = vmax.f32 %v1261_v37, 0.0  ;;  %v1263_v42 = vadd.f32 %v1262_v35, %v1220_v38  ;;  %v1222_v43 = vadd.f32 %v1221_v39, %v430_v14 }
 0x219   :  { %v1567_v19 = vpack.c.bf16 %v1270_v41, %v1269_v40  ;;  %v1265_v50 = vadd.f32 %v1264_v44, %v1222_v43  ;;  %v1273_v52 = vmax.f32 %v1263_v42, 0.0 }
 0x21b   :  { %v1310_v51 = vunpack.c.l.bf16 %v1567_v19  ;;  %v1274_v53 = vmax.f32 %v1265_v50, 0.0  ;;  %v1311_v56 = vunpack.c.h.bf16 %v1567_v19 }
 0x21d   :  { %v1569_v60 = vpack.c.bf16 %v1274_v53, %v1273_v52  ;;  %v1339_v61 = vmul.f32 %v1328_v45, %v1310_v51  ;;  %v1340_v20 = vmul.f32 %v1332_v17, %v1311_v56 }
 0x21f   :  { %v1314_v62 = vunpack.c.l.bf16 %v1569_v60  ;;  %v1315_v63 = vunpack.c.h.bf16 %v1569_v60  ;;  %v1346_v0 = vadd.f32 %v1345_v57, %v1339_v61 }
 0x221   :  { %v1347_v1 = vadd.f32 %v1346_v0, %v1340_v20  ;;  %v1343_v2 = vmul.f32 %v1328_v45, %v1314_v62  ;;  %v1344_v4 = vmul.f32 %v1332_v17, %v1315_v63 }
 0x223   :  { %1348 = vadd.xlane.f32.xlu0 %v1347_v1  ;;  %v1351_v5 = vadd.f32 %v1350_v3, %v1343_v2 }
 0x225   :  { %v1352_v18 = vadd.f32 %v1351_v5, %v1344_v4 }
 0x227   :  { %1353 = vadd.xlane.f32.xlu0 %v1352_v18 }
 0x2ac   :  { %v1349_v6 = vpop.xlane.xlu0 %1348 }
 0x2ad   :  { %v1362_v55 = vadd.f32 %v1561_v54, %v1349_v6 }
 0x2af   :  { %1365 = vst.msk [vmem:[#allocation11] sm:$0xff] %vm1364_vm1, %v1362_v55 }
 0x2b0   :  { %v1354_v7 = vpop.xlane.xlu0 %1353 }
 0x2b6   :  { %v1385_v8 = vld [vmem:[#allocation11] sm:$0x3] }
 0x2b7   :  { %1386 = vst [vmem:[%s1987_s7] sm:$0x3] %v1385_v8 }
 0x2b8   :  { %1404 = vsyncpa [#allocation5], 1 }
 0x2b9   :  { %1405 = vsyncpa [#allocation7], 1 }
 0x2ba   :  { %1406 = vsyncpa [#allocation10], 1 }

</bundles_post_ra>
